<compile_context>
chip_gen: v7x
topology: tpu7x:2x2x1
jax: 0.10.0
libtpu: 0.0.40
codegen_flags: <defaults>
</compile_context>

<pallas_src>
import jax
import jax.numpy as jnp
from jax.experimental import pallas as pl
from jax.experimental.pallas import tpu as pltpu


def set_decoder_kernel(x_ref, m_ref,
                       w1_ref, b1_ref, w2_ref, b2_ref,
                       w3_ref, b3_ref, w4_ref, b4_ref,
                       o_ref):
    # x_ref : (TB, N, d_in)   m_ref : (TB, N)   o_ref : (TB, d_out_padded)
    TB, N, d_in = x_ref.shape
    d_hid = w1_ref.shape[1]

    # Flatten batch block + set axis so phi_individual layer 1 sees M = TB*N.
    x = x_ref[...].reshape(TB * N, d_in)

    # ---- phi_individual layer 1 (MXU, f32 accumulation) ----
    h = jnp.dot(x, w1_ref[...], preferred_element_type=jnp.float32) + b1_ref[...]
    h = jnp.maximum(h, 0.0)                                    # (TB*N, d_hid) f32

    # ---- masked mean pool over the set axis, hoisted BEFORE the W2 matmul.
    #      (W2/b2 are linear: pool(relu1 @ W2 + b2) == pool(relu1) @ W2 + b2*coeff)
    mask = m_ref[...].astype(jnp.float32)                      # (TB, N)
    msum = jnp.sum(mask, axis=1, keepdims=True)                # (TB, 1)
    denom = jnp.maximum(msum, 1.0)
    inv = 1.0 / denom          # exact divide: approx reciprocal would break 1e-5 tol
    coeff = msum * inv         # 1.0 for non-empty sets, 0.0 for fully-masked rows

    h3 = h.reshape(TB, N, d_hid)
    # Elementwise mask + sublane reduction (VPU/XLU — both have slack here).
    pooled = jnp.sum(h3 * mask[:, :, None], axis=1) * inv      # (TB, d_hid) f32

    # ---- phi_individual layer 2 on the pooled representation (M = TB, not TB*N)
    p = jnp.dot(pooled.astype(w2_ref.dtype), w2_ref[...],
                preferred_element_type=jnp.float32) + b2_ref[...] * coeff  # (TB, phi_dim)

    # ---- phi_aggregate MLP ----
    g = jnp.dot(p.astype(w3_ref.dtype), w3_ref[...],
                preferred_element_type=jnp.float32) + b3_ref[...]
    g = jnp.maximum(g, 0.0)
    out = jnp.dot(g.astype(w4_ref.dtype), w4_ref[...],
                  preferred_element_type=jnp.float32) + b4_ref[...]

    o_ref[...] = out.astype(o_ref.dtype)                       # lane-dense (TB, 128k)


def set_decoder_forward(x_set, mask, params, *, block_batch=None,
                        compute_dtype=jnp.bfloat16):
    """x_set: (B, N, d_in); mask: (B, N) of {0.,1.}. Returns (B, d_out) float32."""
    B, N, d_in = x_set.shape
    w1, b1, w2, b2, w3, b3, w4, b4 = params
    d_hid = w1.shape[1]
    phi_dim = w2.shape[1]
    d_out = w4.shape[1]

    LANE, SUB = 128, 8

    # Pad the set axis to a sublane multiple: the in-kernel flatten/reshape then
    # never crosses an (8,128) tile boundary (no relayout copies).
    Np = pl.cdiv(N, SUB) * SUB
    # Lane-dense output: pad the last linear layer (and the output) to 128 cols.
    d_out_p = pl.cdiv(d_out, LANE) * LANE

    # ---- batch tile selection --------------------------------------------
    MIN_GRID = 8            # >= 2 steps per TensorCore on v7x + pipeline depth
    TARGET_ROWS = 8192      # flattened TB*Np rows per step (~0.5-2 MiB of x)
    if block_batch is None:
        tb = max(SUB, (TARGET_ROWS // Np) // SUB * SUB)
        if B >= MIN_GRID * SUB:
            # don't collapse the grid to 1-2 steps for moderate batch sizes
            tb = min(tb, max(SUB, (B // MIN_GRID) // SUB * SUB))
    else:
        tb = int(block_batch)

    TB = B if tb >= B else max(SUB, (tb // SUB) * SUB)

    # ---- VMEM budget using PADDED tile sizes (sub-128 feature dims inflate to
    #      128 lanes; x/mask/out are double-buffered by the pipeline). --------
    csize = jnp.dtype(compute_dtype).itemsize

    def _step_vmem_bytes(tbv):
        x_tile = tbv * Np * LANE * csize * 2     # x block, double-buffered
        io_tile = tbv * LANE * 4 * 2 * 2         # mask + padded out (f32), x2 buffers
        interm = tbv * Np * LANE * 4 * 2         # relu1 f32 + masked temp f32
        return x_tile + io_tile + interm

    VMEM_STEP_BUDGET = 12 * 1024 * 1024          # headroom under the 32 MiB scoped limit
    while TB > SUB and _step_vmem_bytes(TB) > VMEM_STEP_BUDGET:
        TB = max(SUB, (TB // 2 // SUB) * SUB)

    Bp = pl.cdiv(B, TB) * TB

    # ---- pad / cast inputs ----
    x_in = x_set.astype(compute_dtype)
    mask2 = mask.astype(jnp.float32)
    if Np != N:
        x_in = jnp.pad(x_in, ((0, 0), (0, Np - N), (0, 0)))
        mask2 = jnp.pad(mask2, ((0, 0), (0, Np - N)))         # padded elements masked out
    if Bp != B:
        x_in = jnp.pad(x_in, ((0, Bp - B), (0, 0), (0, 0)))
        mask2 = jnp.pad(mask2, ((0, Bp - B), (0, 0)))         # padded sets -> dropped later

    w1c = w1.astype(compute_dtype)
    w2c = w2.astype(compute_dtype)
    w3c = w3.astype(compute_dtype)
    w4p = jnp.pad(w4, ((0, 0), (0, d_out_p - d_out))).astype(compute_dtype)
    b4p = jnp.pad(b4, ((0, 0), (0, d_out_p - d_out)))

    # Weights/biases: full-array blocks, constant index map -> resident in VMEM.
    def const_spec(shape):
        nd = len(shape)
        return pl.BlockSpec(shape, lambda i: (0,) * nd)

    out = pl.pallas_call(
        set_decoder_kernel,
        out_shape=jax.ShapeDtypeStruct((Bp, d_out_p), jnp.float32),
        grid_spec=pltpu.PrefetchScalarGridSpec(
            num_scalar_prefetch=0,
            grid=(Bp // TB,),
            in_specs=[
                pl.BlockSpec((TB, Np, d_in), lambda i: (i, 0, 0)),   # x block
                pl.BlockSpec((TB, Np),       lambda i: (i, 0)),      # lane-dense mask
                const_spec((d_in, d_hid)),                           # W1
                const_spec((1, d_hid)),                              # b1
                const_spec((d_hid, phi_dim)),                        # W2
                const_spec((1, phi_dim)),                            # b2
                const_spec((phi_dim, d_hid)),                        # W3
                const_spec((1, d_hid)),                              # b3
                const_spec((d_hid, d_out_p)),                        # W4 (lane-padded)
                const_spec((1, d_out_p)),                            # b4 (lane-padded)
            ],
            out_specs=pl.BlockSpec((TB, d_out_p), lambda i: (i, 0)), # lane-dense output
        ),
        compiler_params=pltpu.CompilerParams(
            dimension_semantics=("parallel",),
            vmem_limit_bytes=32 * 1024 * 1024,
        ),
    )(x_in, mask2, w1c, b1, w2c, b2, w3c, b3, w4p, b4p)

    return out[:B, :d_out]


def reference_forward(x_set, mask, params):
    w1, b1, w2, b2, w3, b3, w4, b4 = params
    m = mask[..., None].astype(jnp.float32)                            # (B, N, 1)
    h = jnp.maximum(x_set @ w1 + b1, 0.0)
    h = (h @ w2 + b2) * m
    pooled = jnp.sum(h, axis=1) / jnp.maximum(jnp.sum(m, axis=1), 1.0)  # (B, phi_dim)
    g = jnp.maximum(pooled @ w3 + b3, 0.0)
    return g @ w4 + b4


def init_params(key, d_in, d_hid, phi_dim, d_out, init_mean=0.0, init_std=0.02):
    ks = jax.random.split(key, 4)

    def lin(k, fan_in, fan_out):
        w = init_mean + init_std * jax.random.normal(k, (fan_in, fan_out), jnp.float32)
        b = jnp.zeros((1, fan_out), jnp.float32)
        return w, b

    w1, b1 = lin(ks[0], d_in, d_hid)
    w2, b2 = lin(ks[1], d_hid, phi_dim)
    w3, b3 = lin(ks[2], phi_dim, d_hid)
    w4, b4 = lin(ks[3], d_hid, d_out)
    return (w1, b1, w2, b2, w3, b3, w4, b4)


if __name__ == "__main__":
    B, N = 16, 8
    d_in, d_hid, phi_dim, d_out = 32, 64, 32, 16

    key = jax.random.PRNGKey(0)
    k_x, k_p = jax.random.split(key)

    x_set = jax.random.normal(k_x, (B, N, d_in), jnp.float32)
    # variable-length sets: batch b has 1 + (b % N) valid elements
    lengths = 1 + (jnp.arange(B) % N)
    mask = (jnp.arange(N)[None, :] < lengths[:, None]).astype(jnp.float32)

    params = init_params(k_p, d_in, d_hid, phi_dim, d_out,
                         init_mean=0.0, init_std=0.02)
    ref = reference_forward(x_set, mask, params)

    # Strict check on the f32 compute path (validates the W2-through-pool fusion
    # and the multi-step batch-tiled grid, grid=(2,) with block_batch=8).
    out_f32 = jax.block_until_ready(
        set_decoder_forward(x_set, mask, params, block_batch=8,
                            compute_dtype=jnp.float32))
    assert out_f32.shape == (B, d_out)
    assert jnp.allclose(out_f32, ref, atol=1e-5, rtol=1e-5), "f32 mismatch vs reference"

    # Default bf16 compute path (native MXU, half the x HBM traffic): looser tol.
    out_bf16 = jax.block_until_ready(
        set_decoder_forward(x_set, mask, params, block_batch=8))
    assert out_bf16.shape == (B, d_out)
    assert jnp.allclose(out_bf16, ref, atol=5e-3, rtol=5e-2), "bf16 mismatch vs reference"

    print("KERNEL_OK")
</pallas_src>

<mosaic_0001>
module attributes {stable_mosaic.version = 11 : i64} {
  func.func @set_decoder_kernel(%arg0: i32, %arg1: memref<8x8x32xf32, #tpu.memory_space<vmem>>, %arg2: memref<8x8xf32, #tpu.memory_space<vmem>>, %arg3: memref<32x64xf32, #tpu.memory_space<vmem>>, %arg4: memref<1x64xf32, #tpu.memory_space<vmem>>, %arg5: memref<64x32xf32, #tpu.memory_space<vmem>>, %arg6: memref<1x32xf32, #tpu.memory_space<vmem>>, %arg7: memref<32x64xf32, #tpu.memory_space<vmem>>, %arg8: memref<1x64xf32, #tpu.memory_space<vmem>>, %arg9: memref<64x128xf32, #tpu.memory_space<vmem>>, %arg10: memref<1x128xf32, #tpu.memory_space<vmem>>, %arg11: memref<8x128xf32, #tpu.memory_space<vmem>>) attributes {dimension_semantics = [#tpu.dimension_semantics<parallel>], iteration_bounds = array<i64: 2>, scalar_prefetch = 0 : i64, scratch_operands = 0 : i64, tpu.core_type = #tpu.core_type<tc>, window_params = [{transform_indices = @transform_0, window_bounds = array<i64: 8, 8, 32>}, {transform_indices = @transform_1, window_bounds = array<i64: 8, 8>}, {pipeline_mode = #tpu.pipeline_mode<synchronous>, transform_indices = @transform_2, window_bounds = array<i64: 32, 64>}, {pipeline_mode = #tpu.pipeline_mode<synchronous>, transform_indices = @transform_3, window_bounds = array<i64: 1, 64>}, {pipeline_mode = #tpu.pipeline_mode<synchronous>, transform_indices = @transform_4, window_bounds = array<i64: 64, 32>}, {pipeline_mode = #tpu.pipeline_mode<synchronous>, transform_indices = @transform_5, window_bounds = array<i64: 1, 32>}, {pipeline_mode = #tpu.pipeline_mode<synchronous>, transform_indices = @transform_6, window_bounds = array<i64: 32, 64>}, {pipeline_mode = #tpu.pipeline_mode<synchronous>, transform_indices = @transform_7, window_bounds = array<i64: 1, 64>}, {pipeline_mode = #tpu.pipeline_mode<synchronous>, transform_indices = @transform_8, window_bounds = array<i64: 64, 128>}, {pipeline_mode = #tpu.pipeline_mode<synchronous>, transform_indices = @transform_9, window_bounds = array<i64: 1, 128>}, {transform_indices = @transform_10, window_bounds = array<i64: 8, 128>}]} {
    %c0 = arith.constant 0 : index
    %c0_0 = arith.constant 0 : index
    %c0_1 = arith.constant 0 : index
    %0 = vector.load %arg1[%c0, %c0_0, %c0_1] : memref<8x8x32xf32, #tpu.memory_space<vmem>>, vector<8x8x32xf32>
    %1 = vector.shape_cast %0 : vector<8x8x32xf32> to vector<64x32xf32>
    %c0_2 = arith.constant 0 : index
    %c0_3 = arith.constant 0 : index
    %2 = vector.load %arg3[%c0_2, %c0_3] : memref<32x64xf32, #tpu.memory_space<vmem>>, vector<32x64xf32>
    %cst = arith.constant dense<0.000000e+00> : vector<64x64xf32>
    %3 = tpu.matmul %1, %2, %cst {dimension_numbers = #tpu.dot_dimension_numbers<[1], [0], [0], [1], [0, 0, 1, 1], [], []>} : vector<64x32xf32>, vector<32x64xf32>, vector<64x64xf32> -> vector<64x64xf32>
    %c0_4 = arith.constant 0 : index
    %c0_5 = arith.constant 0 : index
    %4 = vector.load %arg4[%c0_4, %c0_5] : memref<1x64xf32, #tpu.memory_space<vmem>>, vector<1x64xf32>
    %5 = vector.broadcast %4 : vector<1x64xf32> to vector<64x64xf32>
    %6 = arith.addf %3, %5 : vector<64x64xf32>
    %cst_6 = arith.constant 0.000000e+00 : f32
    %7 = vector.broadcast %cst_6 : f32 to vector<64x64xf32>
    %8 = arith.maximumf %6, %7 : vector<64x64xf32>
    %c0_7 = arith.constant 0 : index
    %c0_8 = arith.constant 0 : index
    %9 = vector.load %arg2[%c0_7, %c0_8] : memref<8x8xf32, #tpu.memory_space<vmem>>, vector<8x8xf32>
    %cst_9 = arith.constant dense<0.000000e+00> : vector<8xf32>
    %10 = vector.multi_reduction <add>, %9, %cst_9 [1] : vector<8x8xf32> to vector<8xf32>
    %11 = vector.shape_cast %10 : vector<8xf32> to vector<8x1xf32>
    %cst_10 = arith.constant 1.000000e+00 : f32
    %12 = vector.broadcast %cst_10 : f32 to vector<8x1xf32>
    %13 = arith.maximumf %11, %12 : vector<8x1xf32>
    %cst_11 = arith.constant 1.000000e+00 : f32
    %14 = vector.broadcast %cst_11 : f32 to vector<8x1xf32>
    %15 = arith.divf %14, %13 : vector<8x1xf32>
    %16 = arith.mulf %11, %15 : vector<8x1xf32>
    %17 = vector.shape_cast %8 : vector<64x64xf32> to vector<8x8x64xf32>
    %18 = vector.shape_cast %9 : vector<8x8xf32> to vector<8x8x1xf32>
    %19 = vector.broadcast %18 : vector<8x8x1xf32> to vector<8x8x64xf32>
    %20 = arith.mulf %17, %19 : vector<8x8x64xf32>
    %cst_12 = arith.constant dense<0.000000e+00> : vector<8x64xf32>
    %21 = vector.multi_reduction <add>, %20, %cst_12 [1] : vector<8x8x64xf32> to vector<8x64xf32>
    %22 = vector.broadcast %15 : vector<8x1xf32> to vector<8x64xf32>
    %23 = arith.mulf %21, %22 : vector<8x64xf32>
    %c0_13 = arith.constant 0 : index
    %c0_14 = arith.constant 0 : index
    %24 = vector.load %arg5[%c0_13, %c0_14] : memref<64x32xf32, #tpu.memory_space<vmem>>, vector<64x32xf32>
    %cst_15 = arith.constant dense<0.000000e+00> : vector<8x32xf32>
    %25 = tpu.matmul %23, %24, %cst_15 {dimension_numbers = #tpu.dot_dimension_numbers<[1], [0], [0], [1], [0, 0, 1, 1], [], []>} : vector<8x64xf32>, vector<64x32xf32>, vector<8x32xf32> -> vector<8x32xf32>
    %c0_16 = arith.constant 0 : index
    %c0_17 = arith.constant 0 : index
    %26 = vector.load %arg6[%c0_16, %c0_17] : memref<1x32xf32, #tpu.memory_space<vmem>>, vector<1x32xf32>
    %27 = vector.broadcast %26 : vector<1x32xf32> to vector<8x32xf32>
    %28 = vector.broadcast %16 : vector<8x1xf32> to vector<8x32xf32>
    %29 = arith.mulf %27, %28 : vector<8x32xf32>
    %30 = arith.addf %25, %29 : vector<8x32xf32>
    %c0_18 = arith.constant 0 : index
    %c0_19 = arith.constant 0 : index
    %31 = vector.load %arg7[%c0_18, %c0_19] : memref<32x64xf32, #tpu.memory_space<vmem>>, vector<32x64xf32>
    %cst_20 = arith.constant dense<0.000000e+00> : vector<8x64xf32>
    %32 = tpu.matmul %30, %31, %cst_20 {dimension_numbers = #tpu.dot_dimension_numbers<[1], [0], [0], [1], [0, 0, 1, 1], [], []>} : vector<8x32xf32>, vector<32x64xf32>, vector<8x64xf32> -> vector<8x64xf32>
    %c0_21 = arith.constant 0 : index
    %c0_22 = arith.constant 0 : index
    %33 = vector.load %arg8[%c0_21, %c0_22] : memref<1x64xf32, #tpu.memory_space<vmem>>, vector<1x64xf32>
    %34 = vector.broadcast %33 : vector<1x64xf32> to vector<8x64xf32>
    %35 = arith.addf %32, %34 : vector<8x64xf32>
    %cst_23 = arith.constant 0.000000e+00 : f32
    %36 = vector.broadcast %cst_23 : f32 to vector<8x64xf32>
    %37 = arith.maximumf %35, %36 : vector<8x64xf32>
    %c0_24 = arith.constant 0 : index
    %c0_25 = arith.constant 0 : index
    %38 = vector.load %arg9[%c0_24, %c0_25] : memref<64x128xf32, #tpu.memory_space<vmem>>, vector<64x128xf32>
    %cst_26 = arith.constant dense<0.000000e+00> : vector<8x128xf32>
    %39 = tpu.matmul %37, %38, %cst_26 {dimension_numbers = #tpu.dot_dimension_numbers<[1], [0], [0], [1], [0, 0, 1, 1], [], []>} : vector<8x64xf32>, vector<64x128xf32>, vector<8x128xf32> -> vector<8x128xf32>
    %c0_27 = arith.constant 0 : index
    %c0_28 = arith.constant 0 : index
    %40 = vector.load %arg10[%c0_27, %c0_28] : memref<1x128xf32, #tpu.memory_space<vmem>>, vector<1x128xf32>
    %41 = vector.broadcast %40 : vector<1x128xf32> to vector<8x128xf32>
    %42 = arith.addf %39, %41 : vector<8x128xf32>
    %c0_29 = arith.constant 0 : index
    %c0_30 = arith.constant 0 : index
    %43 = vector.load %arg11[%c0_29, %c0_30] : memref<8x128xf32, #tpu.memory_space<vmem>>, vector<8x128xf32>
    tpu.vector_store %arg11[%c0_29, %c0_30], %42 {strides = array<i32>} : memref<8x128xf32, #tpu.memory_space<vmem>>, vector<8x128xf32>,
    return
  }
  func.func @transform_0(%arg0: i32) -> (i32, i32, i32) {
    %c0_i32 = arith.constant 0 : i32
    %c0_i32_0 = arith.constant 0 : i32
    %c0_i32_1 = arith.constant 0 : i32
    return %arg0, %c0_i32, %c0_i32_0 : i32, i32, i32
  }
  func.func @transform_1(%arg0: i32) -> (i32, i32) {
    %c0_i32 = arith.constant 0 : i32
    %c0_i32_0 = arith.constant 0 : i32
    return %arg0, %c0_i32 : i32, i32
  }
  func.func @transform_2(%arg0: i32) -> (i32, i32) {
    %c0_i32 = arith.constant 0 : i32
    %c0_i32_0 = arith.constant 0 : i32
    %c0_i32_1 = arith.constant 0 : i32
    return %c0_i32, %c0_i32_0 : i32, i32
  }
  func.func @transform_3(%arg0: i32) -> (i32, i32) {
    %c0_i32 = arith.constant 0 : i32
    %c0_i32_0 = arith.constant 0 : i32
    %c0_i32_1 = arith.constant 0 : i32
    return %c0_i32, %c0_i32_0 : i32, i32
  }
  func.func @transform_4(%arg0: i32) -> (i32, i32) {
    %c0_i32 = arith.constant 0 : i32
    %c0_i32_0 = arith.constant 0 : i32
    %c0_i32_1 = arith.constant 0 : i32
    return %c0_i32, %c0_i32_0 : i32, i32
  }
  func.func @transform_5(%arg0: i32) -> (i32, i32) {
    %c0_i32 = arith.constant 0 : i32
    %c0_i32_0 = arith.constant 0 : i32
    %c0_i32_1 = arith.constant 0 : i32
    return %c0_i32, %c0_i32_0 : i32, i32
  }
  func.func @transform_6(%arg0: i32) -> (i32, i32) {
    %c0_i32 = arith.constant 0 : i32
    %c0_i32_0 = arith.constant 0 : i32
    %c0_i32_1 = arith.constant 0 : i32
    return %c0_i32, %c0_i32_0 : i32, i32
  }
  func.func @transform_7(%arg0: i32) -> (i32, i32) {
    %c0_i32 = arith.constant 0 : i32
    %c0_i32_0 = arith.constant 0 : i32
    %c0_i32_1 = arith.constant 0 : i32
    return %c0_i32, %c0_i32_0 : i32, i32
  }
  func.func @transform_8(%arg0: i32) -> (i32, i32) {
    %c0_i32 = arith.constant 0 : i32
    %c0_i32_0 = arith.constant 0 : i32
    %c0_i32_1 = arith.constant 0 : i32
    return %c0_i32, %c0_i32_0 : i32, i32
  }
  func.func @transform_9(%arg0: i32) -> (i32, i32) {
    %c0_i32 = arith.constant 0 : i32
    %c0_i32_0 = arith.constant 0 : i32
    %c0_i32_1 = arith.constant 0 : i32
    return %c0_i32, %c0_i32_0 : i32, i32
  }
  func.func @transform_10(%arg0: i32) -> (i32, i32) {
    %c0_i32 = arith.constant 0 : i32
    %c0_i32_0 = arith.constant 0 : i32
    return %arg0, %c0_i32 : i32, i32
  }
}

</mosaic_0001>

<bundles_post_ra>
// kernel: tpu_custom_call.1
= control target key start
LH: loop header
LB: loop body
LE: loop exit
PB: predicated region body
PF: predicated region fallthrough
CT: control target
= control target key end

     0   :  { %15 = vsyncpa [#allocation3], 0  ;;  %s1894_s0 = inlined_call_operand.hbm [shape: f32[16,8,32], index: 0, kind: input, shape index: {}]   ;;  %s1895_s1 = inlined_call_operand.vmem [shape: f32[16,8], index: 1, kind: input, shape index: {}]   ;;  %s1896_s2 = inlined_call_operand.vmem [shape: f32[32,64], index: 2, kind: input, shape index: {}]   ;;  %s1897_s3 = inlined_call_operand.vmem [shape: f32[1,64], index: 3, kind: input, shape index: {}]   ;;  %s1898_s4 = inlined_call_operand.vmem [shape: f32[64,32], index: 4, kind: input, shape index: {}]   ;;  %s1899_s5 = inlined_call_operand.vmem [shape: f32[1,32], index: 5, kind: input, shape index: {}]   ;;  %s1900_s6 = inlined_call_operand.hbm [shape: f32[32,64], index: 6, kind: input, shape index: {}]   ;;  %s1901_s7 = inlined_call_operand.vmem [shape: f32[1,64], index: 7, kind: input, shape index: {}]   ;;  %s1902_s8 = inlined_call_operand.vmem [shape: f32[64,128], index: 8, kind: input, shape index: {}]   ;;  %s1903_s9 = inlined_call_operand.vmem [shape: f32[1,128], index: 9, kind: input, shape index: {}]   ;;  %s1904_s10 = inlined_call_operand.hbm [shape: f32[16,128], index: 10, kind: output, shape index: {}]  }
   0x1   :  { %17 = vsyncpa [#allocation3 + $0x1], 0 }
   0x2   :  { %18 = vsyncpa [#allocation6], 0 }
   0x3   :  { %19 = vsyncpa [#allocation4], 0 }
   0x4   :  { %21 = vsyncpa [#allocation4 + $0x1], 0  ;;  %s1550_s13 = smov 0   ;;  %s1552_s14 = smov 0  }
   0x5   :  { %s1554_s15 = smov 0   ;;  %s1556_s16 = smov 0  }
   0x6 LB: > { %1913 = sst [smem:[#allocation11_spill]] %s1473_s13  ;;  %s1571_s17 = sadd.s32 4294967295, %s1485_s16   ;;  %s1485_s16 = sphi %s1556_s16, %s1932_s16   ;;  %s1481_s15 = sphi %s1554_s15, %s1935_s15   ;;  %s1477_s14 = sphi %s1552_s14, %s1934_s14   ;;  %s1473_s13 = sphi %s1550_s13, %s1933_s13  }
   0x7   : > { %s1119_s18 = sadd.s32 4294967294, %s1485_s16   ;;  %p47_p0 = scmp.ne.s32.totalorder %s1477_s14, %s1473_s13 }
   0x8   : > { %p1907_p1 = scmp.eq.s32.totalorder %s1571_s17, 0  ;;  %p271_p3 = scmp.eq.s32.totalorder %s1119_s18, 1 }
   0x9   : > { %p1120_p5 = scmp.ge.s32.totalorder %s1485_s16, 1  ;;  %p278_p7 = scmp.lt.s32.totalorder %s1485_s16, 3 }
   0xa   : > { %p1580_p4 = por %p1907_p1, %p47_p0  ;;  %p1585_p6 = por %p271_p3, %p47_p0 }
   0xb   : > { %p1590_p8 = pnand %p1120_p5, %p278_p7  ;;  %s1487_s22 = smov [#allocation5]  }
   0xc   : > { %s1914_s19 = scalar_select %p1580_p4, 1, 0 }
   0xd   : > { %s1915_s20 = scalar_select %p1585_p6, 1, 0 }
   0xe   : > { %s1917_s21 = scalar_select %p1590_p8, 1, 0 }
   0xf   : > { %1916 = sst [smem:[#allocation12_spill]] %s1915_s20  ;;  %s302_s23 = sshll.u32 %s1487_s22, 4  ;;  %s1594_s23 = int_to_ptr.vmem [resolvable:$true] %s302_s23 }
  0x10   : > { %p1301_p9 = pneg %p1590_p8  ;;  %s1606_s25 = sadd.s32 1, %s1485_s16  }
  0x11   : > { %1919 = sst [smem:[#allocation13_spill]] %s1606_s25  ;;  %s34_s26 = sadd.s32 1, %s1481_s15 }
  0x12   : > { %p1601_p11 = pnand %p1301_p9, %p1907_p1  ;;  %s31_s27 = ssub.s32 %s1485_s16, %s1606_s25 }
  0x13   : > { %s1357_s30 = scalar_lea.hbm %s1900_s6, 512 }
  0x14   : > { %p1358_p12 = scmp.ne.s32.totalorder %s1900_s6, %s1357_s30  ;;  %p1359_p13 = pneg %p1601_p11 }
  0x15   : > { %p1364_p5 = scmp.lt.u32.totalorder %s1357_s30, %s1900_s6 }
  0x16   : > { %p1360_p0 = pnand %p1359_p13, %p1358_p12 }
  0x18   : > { %p1361_p3 = pneg %p1360_p0 }
  0x1a   : > { %p1366_p7 = pnand %p1364_p5, %p1361_p3 }
  0x1c   : > { %1369 = shalt.err (!%p1366_p7)
}
  0x1d   : > { %s1370_s25 = scalar_lea.vmem %s1594_s23, 512  ;;  %p1378_p2 = scmp.lt.s32.totalorder %s1594_s23, %s1594_s23 }
  0x1e   : > { %p1371_p9 = scmp.ne.s32.totalorder %s1594_s23, %s1370_s25  ;;  %p1379_p6 = scmp.lt.s32.totalorder %s1370_s25, %s1370_s25 }
  0x20   : > { %p1373_p10 = pnand %p1371_p9, %p1359_p13  ;;  %p1380_p4 = por %p1379_p6, %p1378_p2 }
  0x22   : > { %p1374_p1 = pneg %p1373_p10 }
  0x24   : > { %p1381_p8 = pnand %p1380_p4, %p1374_p1 }
  0x26   : > { %1384 = shalt.err (!%p1381_p8)
}
  0x27   : > { %s1912_s28 = smov 128   ;;  %s1489_s29 = smov 8  }
  0x28   : > { %1304 = dma.hbm_to_vmem [thread:$0]  (!%p1601_p11), %s1900_s6, 512, %s1594_s23, [#allocation6], %s1912_s28, %s1912_s28, %s1489_s29  }
  0x29   : > { %p32_p1 = scmp.eq.s32.totalorder %s31_s27, 0  ;;  %p41_p2 = scmp.ne.s32.totalorder %s1481_s15, %s1477_s14 }
  0x2a   : > { %p42_p4 = scmp.eq.s32.totalorder %s1485_s16, 0  ;;  %p1314_p6 = scmp.lt.s32.totalorder %s1485_s16, 2 }
  0x2b   : > { %s1640_s11 = scalar_select %p32_p1, %s1481_s15, %s34_s26  }
  0x2c   : > { %p43_p8 = por %p42_p4, %p41_p2  ;;  %p1920_p10 = scmp.eq.s32.totalorder %s1571_s17, 1 }
  0x2d   : > { %s325_s24 = sand.u32 1, %s1481_s15   ;;  %s1150_s18 = sshll.u32 %s1485_s16, 10 }
  0x2e   : > { %p1644_p12 = por %p1920_p10, %p41_p2  ;;  %s1123_s22 = sshll.u32 %s325_s24, 6 }
  0x2f   : > { %s1653_s25 = scalar_lea.hbm %s1894_s0, %s1150_s18  ;;  %s329_s23 = scalar_lea.vmem [#allocation2], %s1123_s22 }
  0x30   : > { %s336_s26 = sshll.u32 %s329_s23, 4  ;;  %p1655_p11 = pnand %p1314_p6, %p43_p8  ;;  %s1659_s26 = int_to_ptr.vmem [resolvable:$true] %s336_s26 }
  0x31   : > { %s1661_s30 = scalar_lea.sflag [#allocation3], %s325_s24  ;;  %s1385_s28 = scalar_lea.hbm %s1653_s25, 1024 }
  0x32   : > { %p1386_p13 = scmp.ne.s32.totalorder %s1653_s25, %s1385_s28  ;;  %p1387_p0 = pneg %p1655_p11 }
  0x33   : > { %s1390_s18 = scalar_lea.hbm %s1894_s0, 2048  ;;  %p1391_p7 = scmp.lt.u32.totalorder %s1653_s25, %s1894_s0 }
  0x34   : > { %p1388_p3 = pnand %p1387_p0, %p1386_p13  ;;  %p1392_p9 = scmp.lt.u32.totalorder %s1390_s18, %s1385_s28 }
  0x35   : > { %p1394_p2 = scmp.lt.u32.totalorder %s1385_s28, %s1653_s25 }
  0x36   : > { %p1389_p5 = pneg %p1388_p3  ;;  %p1393_p1 = por %p1392_p9, %p1391_p7 }
  0x38   : > { %p1395_p4 = por %p1394_p2, %p1393_p1 }
  0x3a   : > { %p1396_p6 = pnand %p1395_p4, %p1389_p5 }
  0x3c   : > { %1399 = shalt.err (!%p1396_p6)
}
  0x3d   : > { %s1400_s24 = scalar_lea.vmem %s1659_s26, 1024  ;;  %s1490_s13 = smov [#allocation2]  }
  0x3e   : > { %p1401_p8 = scmp.ne.s32.totalorder %s1659_s26, %s1400_s24  ;;  %s1405_s20 = sshll.u32 %s1490_s13, 4  ;;  %s1406_s20 = int_to_ptr.vmem [resolvable:$false] %s1405_s20 }
  0x3f   : > { %s1407_s22 = scalar_lea.vmem %s1406_s20, 2048  ;;  %p1408_p3 = scmp.lt.s32.totalorder %s1659_s26, %s1406_s20 }
  0x40   : > { %p1403_p10 = pnand %p1401_p8, %p1387_p0  ;;  %p1409_p7 = scmp.lt.s32.totalorder %s1407_s22, %s1400_s24 }
  0x42   : > { %p1404_p13 = pneg %p1403_p10  ;;  %p1410_p9 = por %p1409_p7, %p1408_p3 }
  0x44   : > { %p1411_p1 = pnand %p1410_p9, %p1404_p13 }
  0x46   : > { %1414 = shalt.err (!%p1411_p1)
}
  0x47   : > { %s1923_s28 = smov 128   ;;  %p1924_p0 = scmp.ne.s32.totalorder %s1917_s21, 0 }
  0x48   : > { %1308 = dma.hbm_to_vmem [thread:$0]  (!%p1655_p11), %s1653_s25, 1024, %s1659_s26, %s1661_s30, %s1923_s28, %s1923_s28, %s1489_s29  }
  0x49   : > { %355 = sbr.rel (%p1924_p0) target bundleno = 1004 (0x3ec), region = 60  ;;  %s1695_s18 = sand.u32 (!%p1924_p0), 1, %s1477_s14  }
  0x4a   : > { %s1127_s23 = sshll.u32 (!%p1924_p0), %s1695_s18, 6  ;;  %s358_s24 = scalar_lea.sflag (!%p1924_p0), [#allocation3], %s1695_s18 }
  0x4b   : > { %s1699_s13 = scalar_lea.vmem (!%p1924_p0), [#allocation2], %s1127_s23  ;;  %p1925_p5 = scmp.ne.s32.totalorder (!%p1924_p0), %s1914_s19, 0 }
  0x50   : > { %1460 = dma.done.wait (%p1925_p5), %s358_s24, 1024  }
  0x51   : > { %1462 = vsyncadd (%p1925_p5), %s358_s24, 4294966272  ;;  %p1926_p11 = scmp.eq.s32.totalorder %s1571_s17, 0 }
  0x53   : > { %1464 = dma.done.wait (%p1926_p11), [#allocation6], 512   ;;  %p1927_p2 = pmov %p1926_p11 }
  0x54   : > { %p407_p4 = scmp.lt.s32.totalorder %s1571_s17, 1  ;;  %v577_v0 = vlaneseq  ;;  %vm430_vm0 = vcmask 261120   ;;  %v419_v2 = vld [vmem:[%s1896_s2] sm:$0xff]  ;;  %v420_v3 = vld [vmem:[%s1896_s2 + $0x8] sm:$0xff]  ;;  %v421_v4 = vld [vmem:[%s1896_s2 + $0x10] sm:$0xff]  ;;  %vm569_vm1 = vcmask 64512  }
  0x55   : > { %1466 = vsyncadd (%p1927_p2), [#allocation6], 4294966784  ;;  %v1255_v5 = vpack.c.bf16 %v420_v3, %v419_v2  ;;  %v422_v6 = vld [vmem:[%s1896_s2 + $0x18] sm:$0xff]  ;;  %v411_v7 = vld [vmem:[%s1699_s13] sm:$0xff]  ;;  %v1491_v37 = vmov 0.0|0.0   ;;  %vm1492_vm2 = vmmov 0  }
  0x56   : > { %s408_s21 = scalar_select %p407_p4, %s1571_s17, 1  ;;  %v578_v1 = vshrl.u32 %v577_v0, 7  ;;  %v1259_v9 = vpack.c.bf16 %v422_v6, %v421_v4  ;;  %1194 = vmatprep.mubr.msk.f32.mxu0 %vm430_vm0, %v411_v7  ;;  %v412_v16 = vld [vmem:[%s1699_s13 + $0x8] sm:$0xff]  ;;  %v413_v17 = vld [vmem:[%s1699_s13 + $0x10] sm:$0xff]  ;;  %v414_v20 = vld [vmem:[%s1699_s13 + $0x18] sm:$0xff]  ;;  %1263 = vmatprep.subr.bf16.mxu1 %v1491_v37  ;;  %v1493_v46 = vmov 0.0  }
  0x57   : > { %1256 = vmatprep.subr.bf16.mxu0 %v1255_v5  ;;  %v415_v21 = vld [vmem:[%s1699_s13 + $0x20] sm:$0xff]  ;;  %v416_v24 = vld [vmem:[%s1699_s13 + $0x28] sm:$0xff]  ;;  %v417_v25 = vld [vmem:[%s1699_s13 + $0x30] sm:$0xff]  ;;  %1222 = vmatprep.mubr.msk.f32.mxu1 %vm1492_vm2, %v1493_v46  ;;  %vm641_vm3 = vcmask 523264   ;;  %vm747_vm4 = vcmask 1041409   ;;  %vm750_vm5 = vcmask 1042434  }
  0x58   : > { %s1130_s29 = sshll.u32 %s408_s21, 3  ;;  %v593_v8 = vsub.s32 2, %v578_v1  ;;  %v579_v10 = vsub.s32 0, %v578_v1  ;;  %1258 = vmatpush3.bf16.msra.mxu0 %v1255_v5  ;;  %v600_v15 = vsub.s32 3, %v578_v1  ;;  %v607_v19 = vsub.s32 4, %v578_v1  ;;  %v418_v28 = vld [vmem:[%s1699_s13 + $0x38] sm:$0xff] }
  0x59   : > { %s410_s21 = scalar_lea.vmem %s1895_s1, %s1130_s29  ;;  %1260 = vmatprep.subr.bf16.mxu0 %v1259_v9  ;;  %v614_v23 = vsub.s32 5, %v578_v1  ;;  %v621_v27 = vsub.s32 6, %v578_v1  ;;  %v586_v29 = vsub.s32 1, %v578_v1  ;;  %v628_v31 = vsub.s32 7, %v578_v1  ;;  %v722_v34 = vld [vmem:[%s1898_s4] sm:$0xff]  ;;  %v723_v35 = vld [vmem:[%s1898_s4 + $0x8] sm:$0xff] }
  0x5a   : > { %v568_v11 = vld [vmem:[%s410_s21] sm:$0xff]  ;;  %v1264_v36 = vpack.c.bf16 %v723_v35, %v722_v34  ;;  %v724_v38 = vld [vmem:[%s1898_s4 + $0x10] sm:$0xff]  ;;  %v725_v39 = vld [vmem:[%s1898_s4 + $0x18] sm:$0xff]  ;;  %vm753_vm6 = vcmask 1043459   ;;  %vm756_vm7 = vcmask 1044484   ;;  %vm759_vm8 = vcmask 1045509  }
  0x5b   : > { %v570_v12 = vsel %vm569_vm1, %v568_v11, 0.0  ;;  %v594_v13 = vrot.slane %v568_v11, %v593_v8  ;;  %v580_v14 = vrot.slane %v568_v11, %v579_v10  ;;  %v601_v18 = vrot.slane %v568_v11, %v600_v15  ;;  %v726_v41 = vld [vmem:[%s1898_s4 + $0x20] sm:$0xff]  ;;  %v727_v42 = vld [vmem:[%s1898_s4 + $0x28] sm:$0xff]  ;;  %v728_v44 = vld [vmem:[%s1898_s4 + $0x30] sm:$0xff]  ;;  %s1129_s21 = sshll.u32 %s1695_s18, 3  ;;  %s1147_s26 = sshll.u32 %s1571_s17, 7 }
  0x5c   : > { %571 = vadd.xlane.f32.xlu0 %v570_v12  ;;  %1262 = vmatpush3.bf16.msra.mxu0 %v1259_v9  ;;  %v608_v22 = vrot.slane %v568_v11, %v607_v19  ;;  %v615_v26 = vrot.slane %v568_v11, %v614_v23  ;;  %v622_v30 = vrot.slane %v568_v11, %v621_v27  ;;  %v729_v45 = vld [vmem:[%s1898_s4 + $0x38] sm:$0xff]  ;;  %v839_v48 = vld [vmem:[#allocation5] sm:$0xff]  ;;  %v840_v49 = vld [vmem:[#allocation5 + $0x8] sm:$0xff]  ;;  %vm762_vm9 = vcmask 1046534   ;;  %s405_s19 = scalar_lea.vmem [#allocation7], %s1129_s21  ;;  %s1850_s20 = scalar_lea.hbm %s1904_s10, %s1147_s26 }
  0x5d   : > { %596 = vbcast.lane.b32.xlu1 %v594_v13, 256  ;;  %v587_v32 = vrot.slane %v568_v11, %v586_v29  ;;  %v629_v33 = vrot.slane %v568_v11, %v628_v31  ;;  %1275 = vmatprep.subr.bf16.mxu0 %v1491_v37  ;;  %v1267_v40 = vpack.c.bf16 %v725_v39, %v724_v38  ;;  %v841_v50 = vld [vmem:[#allocation5 + $0x10] sm:$0xff]  ;;  %v842_v52 = vld [vmem:[#allocation5 + $0x18] sm:$0xff]  ;;  %v1131_v60 = vld [vmem:[%s1897_s3] ss:$0 sm:$0xff]  ;;  %vm765_vm10 = vcmask 1047559  }
  0x5e   : > { %1265 = vmatpush3.bf16.msra.mxu1 %v1264_v36  ;;  %v1270_v43 = vpack.c.bf16 %v727_v42, %v726_v41  ;;  %v1273_v47 = vpack.c.bf16 %v729_v45, %v728_v44  ;;  %v1276_v51 = vpack.c.bf16 %v840_v49, %v839_v48  ;;  %v1279_v53 = vpack.c.bf16 %v842_v52, %v841_v50  ;;  %s1027_s13 = sshll.u32 %s405_s19, 4  ;;  %s1014_s22 = scalar_lea.sflag [#allocation4], %s1695_s18  ;;  %s1852_s13 = int_to_ptr.vmem [resolvable:$true] %s1027_s13 }
  0x5f   : > { %1195 = vmatmul.mubr.msk.f32.vlgmr.msra.gmra.mrb[0].mxu0 %vm430_vm0, %v412_v16  ;;  %1266 = vmatprep.subr.bf16.mxu1 %v1491_v37  ;;  %s1415_s28 = scalar_lea.vmem %s1852_s13, 128  ;;  %s1494_s17 = smov [#allocation7]  }
  0x60   : > { %1197 = vmatprep.mubr.msk.f32.mxu0 %vm430_vm0, %v413_v17  ;;  %1277 = vmatpush3.bf16.msra.mxu0 %v1276_v51  ;;  %p1416_p6 = scmp.ne.s32.totalorder %s1852_s13, %s1415_s28  ;;  %s1419_s23 = sshll.u32 %s1494_s17, 4  ;;  %s1420_s23 = int_to_ptr.vmem [resolvable:$false] %s1419_s23 }
  0x61   : > { %582 = vbcast.lane.b32.xlu1 %v580_v14, 256  ;;  %1278 = vmatprep.subr.bf16.mxu0 %v1491_v37  ;;  %s1421_s24 = scalar_lea.vmem %s1420_s23, 256  ;;  %p1422_p13 = scmp.lt.s32.totalorder %s1852_s13, %s1420_s23 }
  0x62   : > { %1268 = vmatpush3.bf16.msra.mxu1 %v1267_v40  ;;  %p1417_p8 = pnand %p1416_p6, %p1644_p12  ;;  %p1423_p3 = scmp.lt.s32.totalorder %s1421_s24, %s1415_s28 }
  0x63   : > { %1198 = vmatmul.mubr.msk.f32.gmra.mrb[2].mxu0 %vm430_vm0, %v414_v20  ;;  %1269 = vmatprep.subr.bf16.mxu1 %v1491_v37 }
  0x64   : > { %1200 = vmatprep.mubr.msk.f32.mxu0 %vm430_vm0, %v415_v21  ;;  %1280 = vmatpush3.bf16.msra.mxu0 %v1279_v53  ;;  %p1418_p10 = pneg %p1417_p8  ;;  %p1424_p7 = por %p1423_p3, %p1422_p13 }
  0x65   : > { %603 = vbcast.lane.b32.xlu1 %v601_v18, 256 }
  0x66   : > { %1271 = vmatpush3.bf16.msra.mxu1 %v1270_v43  ;;  %p1425_p9 = pnand %p1424_p7, %p1418_p10 }
  0x67   : > { %1201 = vmatmul.mubr.msk.f32.gmra.mrb[4].mxu0 %vm430_vm0, %v416_v24  ;;  %1272 = vmatprep.subr.bf16.mxu1 %v1491_v37 }
  0x68   : > { %1203 = vmatprep.mubr.msk.f32.mxu0 %vm430_vm0, %v417_v25 }
  0x69   : > { %610 = vbcast.lane.b32.xlu1 %v608_v22, 256 }
  0x6a   : > { %1274 = vmatpush3.bf16.msra.mxu1 %v1273_v47 }
  0x6b   : > { %1204 = vmatmul.mubr.msk.f32.gmra.mrb[6].mxu0 %vm430_vm0, %v418_v28  ;;  %1281 = vmatprep.subr.bf16.mxu1 %v1491_v37 }
  0x6c   : > { %1233 = vmatprep.mubr.msk.f32.mxu0 %vm1492_vm2, %v1493_v46 }
  0x6d   : > { %617 = vbcast.lane.b32.xlu1 %v615_v26, 256 }
  0x71   : > { %624 = vbcast.lane.b32.xlu1 %v622_v30, 256 }
  0x72   : > { %589 = vbcast.lane.b32.xlu0 %v587_v32, 256 }
  0x75   : > { %631 = vbcast.lane.b32.xlu1 %v629_v33, 256 }
  0xcf   : > { %v597_v54 = vpop.permute.xlu1 %596 }
  0xd3   : > { %v583_v55 = vpop.permute.xlu1 %582 }
  0xd7   : > { %v604_v57 = vpop.permute.xlu1 %603 }
  0xdb   : > { %v611_v59 = vpop.permute.xlu1 %610 }
  0xdf   : > { %v618_v3 = vpop.permute.xlu1 %617 }
  0xe3   : > { %v625_v23 = vpop.permute.xlu1 %624 }
  0xe7   : > { %v632_v52 = vpop.permute.xlu1 %631 }
  0xe9   : > { %v1777_v56 = vpop.xlane.xlu0 %571 }
  0xea   : > { %v573_v58 = vmax.f32 %v1777_v56, 1.0 }
  0xec   : > { %1355 = vrcp.f32 %v573_v58 }
  0xed   : > { %v590_v1 = vpop.permute.xlu0 %589 }
  0xf6   : > { %v1784_v13 = vpop.eup %1355 }
  0xf7   : > { %v699_v19 = vrot.slane %v1784_v13, 1  ;;  %v701_v25 = vrot.slane %v1784_v13, 3  ;;  %v700_v30 = vrot.slane %v1784_v13, 2 }
 0x132   : > { %v1196_v61 = vpop.f32.mrb[0].mxu0 }
 0x133   : > { %v527_v62 = vadd.f32 %v1196_v61, %v1131_v60  ;;  %v521_v63 = vpop.f32.mrb[1].mxu0 }
 0x134   : > { %v522_v0 = vadd.f32 %v1131_v60, %v521_v63 }
 0x135   : > { %v561_v2 = vmax.f32 %v527_v62, 0.0 }
 0x136   : > { %v560_v4 = vmax.f32 %v522_v0, 0.0  ;;  %v1199_v5 = vpop.f32.mrb[2].mxu0 }
 0x137   : > { %v634_v6 = vmul.f32 %v590_v1, %v561_v2  ;;  %v537_v7 = vadd.f32 %v1199_v5, %v1131_v60  ;;  %v531_v8 = vpop.f32.mrb[3].mxu0 }
 0x138   : > { %v633_v9 = vmul.f32 %v583_v55, %v560_v4  ;;  %v532_v10 = vadd.f32 %v1131_v60, %v531_v8 }
 0x139   : > { %v649_v11 = vsel %vm641_vm3, %v634_v6, 0.0  ;;  %v563_v12 = vmax.f32 %v537_v7, 0.0 }
 0x13a   : > { %v642_v14 = vsel %vm641_vm3, %v633_v9, 0.0  ;;  %v650_v15 = vrot.slane %v649_v11, 4  ;;  %v562_v16 = vmax.f32 %v532_v10, 0.0  ;;  %v1202_v17 = vpop.f32.mrb[4].mxu0 }
 0x13b   : > { %v643_v18 = vrot.slane %v642_v14, 4  ;;  %v636_v20 = vmul.f32 %v604_v57, %v563_v12  ;;  %v547_v21 = vadd.f32 %v1202_v17, %v1131_v60  ;;  %v541_v22 = vpop.f32.mrb[5].mxu0 }
 0x13c   : > { %v651_v24 = vadd.f32 %v650_v15, %v649_v11  ;;  %v635_v26 = vmul.f32 %v597_v54, %v562_v16  ;;  %v542_v27 = vadd.f32 %v1131_v60, %v541_v22 }
 0x13d   : > { %v644_v28 = vadd.f32 %v643_v18, %v642_v14  ;;  %v663_v29 = vsel %vm641_vm3, %v636_v20, 0.0  ;;  %v565_v31 = vmax.f32 %v547_v21, 0.0 }
 0x13e   : > { %v652_v32 = vrot.slane %v651_v24, 2  ;;  %v664_v33 = vrot.slane %v663_v29, 4  ;;  %v656_v34 = vsel %vm641_vm3, %v635_v26, 0.0  ;;  %v564_v35 = vmax.f32 %v542_v27, 0.0  ;;  %v1205_v36 = vpop.f32.mrb[6].mxu0 }
 0x13f   : > { %v645_v38 = vrot.slane %v644_v28, 2  ;;  %v657_v39 = vrot.slane %v656_v34, 4  ;;  %v638_v40 = vmul.f32 %v618_v3, %v565_v31  ;;  %v557_v41 = vadd.f32 %v1205_v36, %v1131_v60  ;;  %v551_v42 = vpop.f32.mrb[7].mxu0 }
 0x140   : > { %v653_v43 = vadd.f32 %v652_v32, %v651_v24  ;;  %v665_v44 = vadd.f32 %v664_v33, %v663_v29  ;;  %v637_v45 = vmul.f32 %v611_v59, %v564_v35  ;;  %v552_v47 = vadd.f32 %v1131_v60, %v551_v42 }
 0x141   : > { %v646_v48 = vadd.f32 %v645_v38, %v644_v28  ;;  %v658_v49 = vadd.f32 %v657_v39, %v656_v34  ;;  %v677_v50 = vsel %vm641_vm3, %v638_v40, 0.0  ;;  %v567_v51 = vmax.f32 %v557_v41, 0.0 }
 0x142   : > { %v654_v53 = vrot.slane %v653_v43, 1  ;;  %v666_v54 = vrot.slane %v665_v44, 2  ;;  %v678_v55 = vrot.slane %v677_v50, 4  ;;  %v670_v57 = vsel %vm641_vm3, %v637_v45, 0.0 }
 0x143   : > { %v647_v58 = vrot.slane %v646_v48, 1  ;;  %v659_v61 = vrot.slane %v658_v49, 2  ;;  %v671_v62 = vrot.slane %v670_v57, 4  ;;  %v566_v63 = vmax.f32 %v552_v47, 0.0 }
 0x144   : > { %v655_v0 = vadd.f32 %v654_v53, %v653_v43  ;;  %v667_v1 = vadd.f32 %v666_v54, %v665_v44  ;;  %v679_v2 = vadd.f32 %v678_v55, %v677_v50  ;;  %v640_v59 = vmul.f32 %v632_v52, %v567_v51 }
 0x145   : > { %v648_v60 = vadd.f32 %v647_v58, %v646_v48  ;;  %v660_v3 = vadd.f32 %v659_v61, %v658_v49  ;;  %v672_v4 = vadd.f32 %v671_v62, %v670_v57  ;;  %v639_v5 = vmul.f32 %v625_v23, %v566_v63 }
 0x146   : > { %v715_v6 = vmul.f32 %v699_v19, %v655_v0  ;;  %v668_v7 = vrot.slane %v667_v1, 1  ;;  %v680_v8 = vrot.slane %v679_v2, 2  ;;  %v691_v9 = vsel %vm641_vm3, %v640_v59, 0.0  ;;  %v924_v0 = vld [vmem:[%s1902_s8] sm:$0xff] }
 0x147   : > { %v714_v10 = vmul.f32 %v1784_v13, %v648_v60  ;;  %v661_v11 = vrot.slane %v660_v3, 1  ;;  %v673_v12 = vrot.slane %v672_v4, 2  ;;  %v684_v14 = vsel %vm641_vm3, %v639_v5, 0.0  ;;  %v927_v60 = vld [vmem:[%s1902_s8 + $0x18] sm:$0xff] }
 0x148   : > { %v746_v15 = vrot.slane %v715_v6, 7  ;;  %v669_v16 = vadd.f32 %v668_v7, %v667_v1  ;;  %v681_v17 = vadd.f32 %v680_v8, %v679_v2  ;;  %v685_v18 = vrot.slane %v684_v14, 4  ;;  %v925_v1 = vld [vmem:[%s1902_s8 + $0x8] sm:$0xff]  ;;  %v926_v2 = vld [vmem:[%s1902_s8 + $0x10] sm:$0xff]  ;;  %v1140_v7 = vld [vmem:[%s1899_s5] ss:$0 sm:$0xff] }
 0x149   : > { %v662_v20 = vadd.f32 %v661_v11, %v660_v3  ;;  %v674_v21 = vadd.f32 %v673_v12, %v672_v4  ;;  %v692_v22 = vrot.slane %v691_v9, 4  ;;  %v703_v32 = vrot.slane %v1784_v13, 5  ;;  %v929_v4 = vld [vmem:[%s1902_s8 + $0x28] sm:$0xff]  ;;  %v930_v12 = vld [vmem:[%s1902_s8 + $0x30] sm:$0xff] }
 0x14a   : > { %v748_v23 = vsel %vm747_vm4, %v746_v15, %v714_v10  ;;  %v717_v19 = vmul.f32 %v701_v25, %v669_v16  ;;  %v682_v24 = vrot.slane %v681_v17, 1  ;;  %v686_v26 = vadd.f32 %v685_v18, %v684_v14  ;;  %v1144_v18 = vld [vmem:[%s1903_s9] ss:$0 sm:$0xff] }
 0x14b   : > { %v716_v27 = vmul.f32 %v700_v30, %v662_v20  ;;  %v675_v28 = vrot.slane %v674_v21, 1  ;;  %v693_v29 = vadd.f32 %v692_v22, %v691_v9  ;;  %v702_v36 = vrot.slane %v1784_v13, 4 }
 0x14c   : > { %v683_v31 = vadd.f32 %v682_v24, %v681_v17  ;;  %v687_v33 = vrot.slane %v686_v26, 2  ;;  %v752_v39 = vrot.slane %v717_v19, 5  ;;  %v704_v49 = vrot.slane %v1784_v13, 6 }
 0x14d   : > { %v749_v34 = vrot.slane %v716_v27, 6  ;;  %v676_v35 = vadd.f32 %v675_v28, %v674_v21  ;;  %v694_v38 = vrot.slane %v693_v29, 2  ;;  %v705_v52 = vrot.slane %v1784_v13, 7 }
 0x14e   : > { %v719_v40 = vmul.f32 %v703_v32, %v683_v31  ;;  %v688_v41 = vadd.f32 %v687_v33, %v686_v26  ;;  %v1282_v59 = vpack.c.bf16 %v925_v1, %v924_v0  ;;  %v1285_v3 = vpack.c.bf16 %v927_v60, %v926_v2 }
 0x14f   : > { %v718_v25 = vmul.f32 %v702_v36, %v676_v35  ;;  %v695_v42 = vadd.f32 %v694_v38, %v693_v29  ;;  %v751_v43 = vsel %vm750_vm5, %v749_v34, %v748_v23  ;;  %v576_v6 = vmul.f32 %v1784_v13, %v1777_v56  ;;  %v1142_v13 = vld [vmem:[%s1901_s7] ss:$0 sm:$0xff] }
 0x150   : > { %v689_v30 = vrot.slane %v688_v41, 1  ;;  %v754_v44 = vsel %vm753_vm6, %v752_v39, %v751_v43  ;;  %v758_v50 = vrot.slane %v719_v40, 3 }
 0x151   : > { %v755_v45 = vrot.slane %v718_v25, 4  ;;  %v696_v47 = vrot.slane %v695_v42, 1  ;;  %v737_v8 = vmul.f32 %v1140_v7, %v576_v6 }
 0x152   : > { %v690_v48 = vadd.f32 %v689_v30, %v688_v41 }
 0x153   : > { %v697_v51 = vadd.f32 %v696_v47, %v695_v42  ;;  %v757_v53 = vsel %vm756_vm7, %v755_v45, %v754_v44 }
 0x154   : > { %v720_v54 = vmul.f32 %v704_v49, %v690_v48  ;;  %v760_v55 = vsel %vm759_vm8, %v758_v50, %v757_v53 }
 0x155   : > { %v721_v57 = vmul.f32 %v705_v52, %v697_v51 }
 0x156   : > { %v761_v58 = vrot.slane %v720_v54, 2 }
 0x157   : > { %v764_v61 = vrot.slane %v721_v57, 1 }
 0x158   : > { %v763_v62 = vsel %vm762_vm9, %v761_v58, %v760_v55 }
 0x159   : > { %v766_v63 = vsel %vm765_vm10, %v764_v61, %v763_v62 }
 0x15a   : > { %1223 = vmatmul.mubr.msk.f32.vlgmr.msra.gmra.mrb[0].mxu1 %vm641_vm3, %v766_v63 }
 0x15b   : > { %1252 = vmatprep.mubr.msk.f32.mxu1 %vm1492_vm2, %v1493_v46  ;;  %1283 = vmatpush3.bf16.msra.mxu1 %v1282_v59  ;;  %v928_v46 = vld [vmem:[%s1902_s8 + $0x20] sm:$0xff] }
 0x15c   : > { %1284 = vmatprep.subr.bf16.mxu1 %v1491_v37  ;;  %v1288_v5 = vpack.c.bf16 %v929_v4, %v928_v46 }
 0x15f   : > { %1286 = vmatpush3.bf16.msra.mxu1 %v1285_v3 }
 0x160   : > { %1287 = vmatprep.subr.bf16.mxu1 %v1491_v37 }
 0x163   : > { %1289 = vmatpush3.bf16.msra.mxu1 %v1288_v5 }
 0x164   : > { %1290 = vmatprep.subr.bf16.mxu1 %v1491_v37  ;;  %v931_v37 = vld [vmem:[%s1902_s8 + $0x38] sm:$0xff] }
 0x165   : > { %v1291_v56 = vpack.c.bf16 %v931_v37, %v930_v12 }
 0x167   : > { %1292 = vmatpush3.bf16.msra.mxu1 %v1291_v56 }
 0x22d   : > { %v835_v9 = vpop.f32.mrb[0].mxu1 }
 0x22e   : > { %v836_v10 = vadd.f32 %v835_v9, %v737_v8  ;;  %v1224_v11 = vpop.f32.mrb[1].mxu1 }
 0x230   : > { %1234 = vmatmul.mubr.msk.f32.vlgmr.msra.gmra.mrb[8].mxu0 %vm430_vm0, %v836_v10 }
 0x303   : > { %v919_v14 = vpop.f32.mrb[8].mxu0 }
 0x304   : > { %v920_v15 = vadd.f32 %v1142_v13, %v919_v14  ;;  %v1235_v16 = vpop.f32.mrb[9].mxu0 }
 0x306   : > { %v923_v17 = vmax.f32 %v920_v15, 0.0 }
 0x308   : > { %1253 = vmatmul.mubr.msk.f32.vlgmr.msra.gmra.mrb[2].mxu1 %vm641_vm3, %v923_v17 }
 0x3db   : > { %v1008_v20 = vpop.f32.mrb[2].mxu1 }
 0x3dc   : > { %v1009_v21 = vadd.f32 %v1144_v18, %v1008_v20  ;;  %v1254_v22 = vpop.f32.mrb[3].mxu1 }
 0x3de   : > { %1012 = vst [vmem:[%s405_s19] sm:$0xff] %v1009_v21 }
 0x3df   : > { %1428 = shalt.err (!%p1425_p9)
}
 0x3e0   : > { %s1429_s18 = scalar_lea.hbm %s1850_s20, 128  ;;  %s1433_s25 = scalar_lea.hbm %s1904_s10, 256 }
 0x3e1   : > { %p1430_p1 = scmp.ne.s32.totalorder %s1850_s20, %s1429_s18  ;;  %p1434_p11 = scmp.lt.u32.totalorder %s1850_s20, %s1904_s10 }
 0x3e2   : > { %p1435_p2 = scmp.lt.u32.totalorder %s1433_s25, %s1429_s18  ;;  %p1437_p6 = scmp.lt.u32.totalorder %s1429_s18, %s1850_s20 }
 0x3e3   : > { %p1431_p0 = pnand %p1430_p1, %p1644_p12 }
 0x3e4   : > { %p1436_p4 = por %p1435_p2, %p1434_p11 }
 0x3e5   : > { %p1432_p5 = pneg %p1431_p0 }
 0x3e6   : > { %p1438_p8 = por %p1437_p6, %p1436_p4 }
 0x3e8   : > { %p1439_p10 = pnand %p1438_p8, %p1432_p5 }
 0x3ea   : > { %1442 = shalt.err (!%p1439_p10)
}
 0x3eb   : > { %1299 = dma.vmem_to_hbm [thread:$0]  (%p1644_p12), %s1852_s13, 128, %s1850_s20, %s1014_s22  }
 0x3ec PF: > { %s1928_s27 = sld [smem:[#allocation11_spill]]  ;;  %s1929_s30 = sld [smem:[#allocation12_spill]] }
 0x3ed   : > { %p1931_p3 = scmp.ge.s32.totalorder %s1485_s16, 2 }
 0x3f2   : > { %s1039_s28 = sand.u32 1, %s1928_s27   ;;  %p1930_p13 = scmp.ne.s32.totalorder %s1929_s30, 0 }
 0x3f3   : > { %s1040_s17 = scalar_lea.sflag [#allocation4], %s1039_s28 }
 0x3f4   : > { %p1310_p7 = pnand %p1931_p3, %p1930_p13 }
 0x3f6   : > { %1468 = dma.done.wait (!%p1310_p7), %s1040_s17, 128  }
 0x3f7   : > { %1470 = vsyncadd (!%p1310_p7), %s1040_s17, 4294967168  ;;  %s1932_s16 = sld [smem:[#allocation13_spill]]  ;;  %s1933_s13 = smov %s1477_s14 }
 0x3f8   : > { %s1934_s14 = smov %s1481_s15  ;;  %s1935_s15 = smov %s1640_s11 }
 0x3fd   : > { %p24_p9 = scmp.ge.s32.totalorder %s1932_s16, 4  }
 0x3ff   :  { %26 = sbr.rel (!%p24_p9) target bundleno = 6 (0x6), region = 112 }
 0x406   :  { %1045 = vsyncpa [#allocation3], 1 }
 0x407   :  { %1047 = vsyncpa [#allocation3 + $0x1], 1 }
 0x408   :  { %1048 = vsyncpa [#allocation6], 1 }
 0x409   :  { %1049 = vsyncpa [#allocation4], 1 }
 0x40a   :  { %1051 = vsyncpa [#allocation4 + $0x1], 1 }

</bundles_post_ra>
